<compile_context>
chip_gen: v7x
topology: tpu7x:2x2x1
jax: 0.10.0
libtpu: 0.0.40
codegen_flags: <defaults>
</compile_context>

<pallas_src>
import functools

import jax
import jax.numpy as jnp
from jax import lax
from jax.experimental import pallas as pl
from jax.experimental.pallas import tpu as pltpu


# ----------------------------------------------------------------------------- kernel
def _conv3x3_tanh_kernel(x_ref, w_ref, o_ref, xp_ref, *, W):
    # x_ref : (1, Cin, HW)          bf16  one NCHW sample, spatial flattened onto lanes
    # w_ref : (Cout, 9*Cin)         bf16  tap-major columns: [:, t*Cin:(t+1)*Cin] == w[:, :, dy, dx]
    # o_ref : (1, Cout, HW)         f32   NCHW output sample, spatial flattened onto lanes
    # xp_ref: (Cin, HW + 2*W + 2)   bf16  VMEM scratch holding the flat zero-padded sample
    Cin, HW = x_ref.shape[1], x_ref.shape[2]
    Cout = o_ref.shape[1]
    PAD = W + 1  # one zero pad row (W) + 1 corner slot on each side of the flat layout

    # Build the flat zero-padded sample in VMEM. Re-written every step: scratch persists per core,
    # and under megacore "parallel" not every core runs program_id==0, so no one-time init.
    zeros_pad = jnp.zeros((Cin, PAD), xp_ref.dtype)
    xp_ref[:, :PAD] = zeros_pad
    xp_ref[:, PAD + HW:] = zeros_pad
    xp_ref[:, PAD:PAD + HW] = x_ref[0]          # full lane-dense interior write

    # Column-validity masks (top/bottom rows are handled by the zero pad rows in the scratch;
    # only the horizontal wrap of the flat layout needs masking). W=16 -> the %W folds to an AND.
    col = lax.broadcasted_iota(jnp.int32, (1, HW), 1) % W
    not_left = col != 0           # tap dx == 0 is invalid at x == 0
    not_right = col != (W - 1)    # tap dx == 2 is invalid at x == W-1

    # 9 accumulating tap matmuls on the MXU (bf16 in, f32 accumulate). Each tap is a contiguous
    # lane slice of the padded scratch -> no reshape, no concatenated im2col slab.
    acc = jnp.zeros((Cout, HW), jnp.float32)
    for dy in range(3):
        for dx in range(3):
            t = dy * 3 + dx
            start = dy * W + dx
            tap = xp_ref[:, start:start + HW]                      # (Cin, HW) bf16
            w_blk = w_ref[:, t * Cin:(t + 1) * Cin]                # (Cout, Cin) bf16
            contrib = jnp.dot(w_blk, tap, preferred_element_type=jnp.float32)
            if dx == 0:
                contrib = jnp.where(not_left, contrib, 0.0)
            elif dx == 2:
                contrib = jnp.where(not_right, contrib, 0.0)
            acc = acc + contrib

    o_ref[0] = jnp.tanh(acc).astype(o_ref.dtype)                   # lane-dense (Cout, HW) store


# ----------------------------------------------------------------------------- wrapper
def get_image_g_forward(h_code_nchw, w_oihw):
    """h_code_nchw: (N, ngf, H, W) f32; w_oihw: (3, ngf, 3, 3) PyTorch conv weight (no bias).
    Returns (N, 3, H, W) f32 = Tanh(Conv3x3_pad1(h_code))."""
    N, Cin, H, W = h_code_nchw.shape
    Cout = w_oihw.shape[0]
    HW = H * W

    # Metadata-only reshape + one bf16 cast (halves kernel HBM->VMEM DMA bytes); no transposes.
    x_flat = h_code_nchw.reshape(N, Cin, HW).astype(jnp.bfloat16)
    # Tap-major, channel-minor weight columns: (Cout, ky, kx, Cin) -> (Cout, 9*Cin).
    w2d = jnp.transpose(w_oihw, (0, 2, 3, 1)).reshape(Cout, 9 * Cin).astype(jnp.bfloat16)

    kernel = functools.partial(_conv3x3_tanh_kernel, W=W)

    out_flat = pl.pallas_call(
        kernel,
        out_shape=jax.ShapeDtypeStruct((N, Cout, HW), jnp.float32),
        grid=(N,),  # N >= 2 grid steps, "parallel" -> both v7x TensorCores get work
        in_specs=[pl.BlockSpec((1, Cin, HW), lambda n: (n, 0, 0)),
                  pl.BlockSpec((Cout, 9 * Cin), lambda n: (0, 0))],
        out_specs=pl.BlockSpec((1, Cout, HW), lambda n: (n, 0, 0)),
        scratch_shapes=[pltpu.VMEM((Cin, HW + 2 * W + 2), jnp.bfloat16)],
        compiler_params=pltpu.CompilerParams(
            dimension_semantics=("parallel",),
            vmem_limit_bytes=32 * 1024 * 1024),
    )(x_flat, w2d)

    # Pure metadata reshape back to NCHW (output already channel-major): no HBM transpose.
    return out_flat.reshape(N, Cout, H, W)


# ----------------------------------------------------------------------------- main
if __name__ == "__main__":
    ngf, N, H, W = 16, 2, 16, 16

    key = jax.random.PRNGKey(0)
    k1, k2 = jax.random.split(key)
    h_code = jax.random.normal(k1, (N, ngf, H, W), jnp.float32)
    w_oihw = 0.05 * jax.random.normal(k2, (3, ngf, 3, 3), jnp.float32)   # conv3x3(ngf->3), no bias

    out = jax.block_until_ready(get_image_g_forward(h_code, w_oihw))

    assert out.shape == (N, 3, H, W), out.shape
    assert bool(jnp.all(jnp.isfinite(out)))

    # Reference: XLA conv + tanh in f32 (NCHW/OIHW). Small, bounded bf16-input drift expected.
    ref = jnp.tanh(lax.conv_general_dilated(
        h_code, w_oihw, window_strides=(1, 1), padding=((1, 1), (1, 1)),
        dimension_numbers=("NCHW", "OIHW", "NCHW")))
    err = float(jnp.max(jnp.abs(out - ref)))
    assert err < 5e-2, err

    print("KERNEL_OK")
</pallas_src>

<mosaic_0001>
module attributes {stable_mosaic.version = 11 : i64} {
  func.func @_conv3x3_tanh_kernel(%arg0: i32, %arg1: memref<1x16x256xbf16, #tpu.memory_space<vmem>>, %arg2: memref<3x144xbf16, #tpu.memory_space<vmem>>, %arg3: memref<1x3x256xf32, #tpu.memory_space<vmem>>, %arg4: memref<16x290xbf16, #tpu.memory_space<vmem>>) attributes {dimension_semantics = [#tpu.dimension_semantics<parallel>], iteration_bounds = array<i64: 2>, scalar_prefetch = 0 : i64, scratch_operands = 1 : i64, tpu.core_type = #tpu.core_type<tc>, window_params = [{transform_indices = @transform_0, window_bounds = array<i64: 1, 16, 256>}, {pipeline_mode = #tpu.pipeline_mode<synchronous>, transform_indices = @transform_1, window_bounds = array<i64: 3, 144>}, {transform_indices = @transform_2, window_bounds = array<i64: 1, 3, 256>}]} {
    %cst = arith.constant 0.000000e+00 : bf16
    %0 = vector.broadcast %cst : bf16 to vector<16x17xbf16>
    %c0 = arith.constant 0 : index
    %c0_0 = arith.constant 0 : index
    %1 = vector.load %arg4[%c0, %c0_0] : memref<16x290xbf16, #tpu.memory_space<vmem>>, vector<16x17xbf16>
    tpu.vector_store %arg4[%c0, %c0_0], %0 {strides = array<i32>} : memref<16x290xbf16, #tpu.memory_space<vmem>>, vector<16x17xbf16>,
    %c0_1 = arith.constant 0 : index
    %c273 = arith.constant 273 : index
    %2 = vector.load %arg4[%c0_1, %c273] : memref<16x290xbf16, #tpu.memory_space<vmem>>, vector<16x17xbf16>
    tpu.vector_store %arg4[%c0_1, %c273], %0 {strides = array<i32>} : memref<16x290xbf16, #tpu.memory_space<vmem>>, vector<16x17xbf16>,
    %c0_2 = arith.constant 0 : index
    %c0_3 = arith.constant 0 : index
    %c0_4 = arith.constant 0 : index
    %3 = vector.load %arg1[%c0_2, %c0_3, %c0_4] : memref<1x16x256xbf16, #tpu.memory_space<vmem>>, vector<1x16x256xbf16>
    %4 = vector.shape_cast %3 : vector<1x16x256xbf16> to vector<16x256xbf16>
    %c0_5 = arith.constant 0 : index
    %c17 = arith.constant 17 : index
    %5 = vector.load %arg4[%c0_5, %c17] : memref<16x290xbf16, #tpu.memory_space<vmem>>, vector<16x256xbf16>
    tpu.vector_store %arg4[%c0_5, %c17], %4 {strides = array<i32>} : memref<16x290xbf16, #tpu.memory_space<vmem>>, vector<16x256xbf16>,
    %6 = tpu.iota {dimensions = array<i32: 1>} : vector<1x256xi32>
    %c16_i32 = arith.constant 16 : i32
    %c0_i32 = arith.constant 0 : i32
    %7 = arith.cmpi eq, %c16_i32, %c0_i32 : i32
    %c1_i32 = arith.constant 1 : i32
    %8 = arith.select %7, %c1_i32, %c16_i32 : i32
    %9 = vector.broadcast %8 : i32 to vector<1x256xi32>
    %10 = arith.remsi %6, %9 : vector<1x256xi32>
    %c0_i32_6 = arith.constant 0 : i32
    %11 = vector.broadcast %c0_i32_6 : i32 to vector<1x256xi32>
    %12 = arith.cmpi ne, %10, %11 : vector<1x256xi32>
    %c0_i32_7 = arith.constant 0 : i32
    %13 = vector.broadcast %c0_i32_7 : i32 to vector<1x256xi32>
    %14 = arith.cmpi slt, %10, %13 : vector<1x256xi32>
    %c0_i32_8 = arith.constant 0 : i32
    %15 = arith.cmpi slt, %8, %c0_i32_8 : i32
    %16 = vector.broadcast %15 : i1 to vector<1x256xi1>
    %17 = vector.broadcast %16 : vector<1x256xi1> to vector<1x256xi1>
    %18 = arith.xori %14, %17 : vector<1x256xi1>
    %19 = arith.andi %18, %12 : vector<1x256xi1>
    %20 = vector.broadcast %8 : i32 to vector<1x256xi32>
    %21 = arith.addi %10, %20 : vector<1x256xi32>
    %22 = arith.select %19, %21, %10 : vector<1x256xi1>, vector<1x256xi32>
    %c0_i32_9 = arith.constant 0 : i32
    %23 = vector.broadcast %c0_i32_9 : i32 to vector<1x256xi32>
    %24 = arith.cmpi ne, %22, %23 : vector<1x256xi32>
    %c15_i32 = arith.constant 15 : i32
    %25 = vector.broadcast %c15_i32 : i32 to vector<1x256xi32>
    %26 = arith.cmpi ne, %22, %25 : vector<1x256xi32>
    %cst_10 = arith.constant 0.000000e+00 : f32
    %27 = vector.broadcast %cst_10 : f32 to vector<3x256xf32>
    %c0_11 = arith.constant 0 : index
    %c0_12 = arith.constant 0 : index
    %28 = vector.load %arg4[%c0_11, %c0_12] : memref<16x290xbf16, #tpu.memory_space<vmem>>, vector<16x256xbf16>
    %c0_13 = arith.constant 0 : index
    %c0_14 = arith.constant 0 : index
    %29 = vector.load %arg2[%c0_13, %c0_14] : memref<3x144xbf16, #tpu.memory_space<vmem>>, vector<3x16xbf16>
    %cst_15 = arith.constant dense<0.000000e+00> : vector<3x256xf32>
    %30 = tpu.matmul %29, %28, %cst_15 {dimension_numbers = #tpu.dot_dimension_numbers<[1], [0], [0], [1], [0, 0, 1, 1], [], []>} : vector<3x16xbf16>, vector<16x256xbf16>, vector<3x256xf32> -> vector<3x256xf32>
    %cst_16 = arith.constant 0.000000e+00 : f32
    %31 = vector.shape_cast %24 : vector<1x256xi1> to vector<1x256xi1>
    %32 = vector.broadcast %31 : vector<1x256xi1> to vector<3x256xi1>
    %33 = vector.broadcast %cst_16 : f32 to vector<3x256xf32>
    %34 = arith.select %32, %30, %33 : vector<3x256xi1>, vector<3x256xf32>
    %35 = arith.addf %27, %34 : vector<3x256xf32>
    %c0_17 = arith.constant 0 : index
    %c1 = arith.constant 1 : index
    %36 = vector.load %arg4[%c0_17, %c1] : memref<16x290xbf16, #tpu.memory_space<vmem>>, vector<16x256xbf16>
    %c0_18 = arith.constant 0 : index
    %c16 = arith.constant 16 : index
    %37 = vector.load %arg2[%c0_18, %c16] : memref<3x144xbf16, #tpu.memory_space<vmem>>, vector<3x16xbf16>
    %cst_19 = arith.constant dense<0.000000e+00> : vector<3x256xf32>
    %38 = tpu.matmul %37, %36, %cst_19 {dimension_numbers = #tpu.dot_dimension_numbers<[1], [0], [0], [1], [0, 0, 1, 1], [], []>} : vector<3x16xbf16>, vector<16x256xbf16>, vector<3x256xf32> -> vector<3x256xf32>
    %39 = arith.addf %35, %38 : vector<3x256xf32>
    %c0_20 = arith.constant 0 : index
    %c2 = arith.constant 2 : index
    %40 = vector.load %arg4[%c0_20, %c2] : memref<16x290xbf16, #tpu.memory_space<vmem>>, vector<16x256xbf16>
    %c0_21 = arith.constant 0 : index
    %c32 = arith.constant 32 : index
    %41 = vector.load %arg2[%c0_21, %c32] : memref<3x144xbf16, #tpu.memory_space<vmem>>, vector<3x16xbf16>
    %cst_22 = arith.constant dense<0.000000e+00> : vector<3x256xf32>
    %42 = tpu.matmul %41, %40, %cst_22 {dimension_numbers = #tpu.dot_dimension_numbers<[1], [0], [0], [1], [0, 0, 1, 1], [], []>} : vector<3x16xbf16>, vector<16x256xbf16>, vector<3x256xf32> -> vector<3x256xf32>
    %cst_23 = arith.constant 0.000000e+00 : f32
    %43 = vector.shape_cast %26 : vector<1x256xi1> to vector<1x256xi1>
    %44 = vector.broadcast %43 : vector<1x256xi1> to vector<3x256xi1>
    %45 = vector.broadcast %cst_23 : f32 to vector<3x256xf32>
    %46 = arith.select %44, %42, %45 : vector<3x256xi1>, vector<3x256xf32>
    %47 = arith.addf %39, %46 : vector<3x256xf32>
    %c0_24 = arith.constant 0 : index
    %c16_25 = arith.constant 16 : index
    %48 = vector.load %arg4[%c0_24, %c16_25] : memref<16x290xbf16, #tpu.memory_space<vmem>>, vector<16x256xbf16>
    %c0_26 = arith.constant 0 : index
    %c48 = arith.constant 48 : index
    %49 = vector.load %arg2[%c0_26, %c48] : memref<3x144xbf16, #tpu.memory_space<vmem>>, vector<3x16xbf16>
    %cst_27 = arith.constant dense<0.000000e+00> : vector<3x256xf32>
    %50 = tpu.matmul %49, %48, %cst_27 {dimension_numbers = #tpu.dot_dimension_numbers<[1], [0], [0], [1], [0, 0, 1, 1], [], []>} : vector<3x16xbf16>, vector<16x256xbf16>, vector<3x256xf32> -> vector<3x256xf32>
    %cst_28 = arith.constant 0.000000e+00 : f32
    %51 = vector.shape_cast %24 : vector<1x256xi1> to vector<1x256xi1>
    %52 = vector.broadcast %51 : vector<1x256xi1> to vector<3x256xi1>
    %53 = vector.broadcast %cst_28 : f32 to vector<3x256xf32>
    %54 = arith.select %52, %50, %53 : vector<3x256xi1>, vector<3x256xf32>
    %55 = arith.addf %47, %54 : vector<3x256xf32>
    %c0_29 = arith.constant 0 : index
    %c17_30 = arith.constant 17 : index
    %56 = vector.load %arg4[%c0_29, %c17_30] : memref<16x290xbf16, #tpu.memory_space<vmem>>, vector<16x256xbf16>
    %c0_31 = arith.constant 0 : index
    %c64 = arith.constant 64 : index
    %57 = vector.load %arg2[%c0_31, %c64] : memref<3x144xbf16, #tpu.memory_space<vmem>>, vector<3x16xbf16>
    %cst_32 = arith.constant dense<0.000000e+00> : vector<3x256xf32>
    %58 = tpu.matmul %57, %56, %cst_32 {dimension_numbers = #tpu.dot_dimension_numbers<[1], [0], [0], [1], [0, 0, 1, 1], [], []>} : vector<3x16xbf16>, vector<16x256xbf16>, vector<3x256xf32> -> vector<3x256xf32>
    %59 = arith.addf %55, %58 : vector<3x256xf32>
    %c0_33 = arith.constant 0 : index
    %c18 = arith.constant 18 : index
    %60 = vector.load %arg4[%c0_33, %c18] : memref<16x290xbf16, #tpu.memory_space<vmem>>, vector<16x256xbf16>
    %c0_34 = arith.constant 0 : index
    %c80 = arith.constant 80 : index
    %61 = vector.load %arg2[%c0_34, %c80] : memref<3x144xbf16, #tpu.memory_space<vmem>>, vector<3x16xbf16>
    %cst_35 = arith.constant dense<0.000000e+00> : vector<3x256xf32>
    %62 = tpu.matmul %61, %60, %cst_35 {dimension_numbers = #tpu.dot_dimension_numbers<[1], [0], [0], [1], [0, 0, 1, 1], [], []>} : vector<3x16xbf16>, vector<16x256xbf16>, vector<3x256xf32> -> vector<3x256xf32>
    %cst_36 = arith.constant 0.000000e+00 : f32
    %63 = vector.shape_cast %26 : vector<1x256xi1> to vector<1x256xi1>
    %64 = vector.broadcast %63 : vector<1x256xi1> to vector<3x256xi1>
    %65 = vector.broadcast %cst_36 : f32 to vector<3x256xf32>
    %66 = arith.select %64, %62, %65 : vector<3x256xi1>, vector<3x256xf32>
    %67 = arith.addf %59, %66 : vector<3x256xf32>
    %c0_37 = arith.constant 0 : index
    %c32_38 = arith.constant 32 : index
    %68 = vector.load %arg4[%c0_37, %c32_38] : memref<16x290xbf16, #tpu.memory_space<vmem>>, vector<16x256xbf16>
    %c0_39 = arith.constant 0 : index
    %c96 = arith.constant 96 : index
    %69 = vector.load %arg2[%c0_39, %c96] : memref<3x144xbf16, #tpu.memory_space<vmem>>, vector<3x16xbf16>
    %cst_40 = arith.constant dense<0.000000e+00> : vector<3x256xf32>
    %70 = tpu.matmul %69, %68, %cst_40 {dimension_numbers = #tpu.dot_dimension_numbers<[1], [0], [0], [1], [0, 0, 1, 1], [], []>} : vector<3x16xbf16>, vector<16x256xbf16>, vector<3x256xf32> -> vector<3x256xf32>
    %cst_41 = arith.constant 0.000000e+00 : f32
    %71 = vector.shape_cast %24 : vector<1x256xi1> to vector<1x256xi1>
    %72 = vector.broadcast %71 : vector<1x256xi1> to vector<3x256xi1>
    %73 = vector.broadcast %cst_41 : f32 to vector<3x256xf32>
    %74 = arith.select %72, %70, %73 : vector<3x256xi1>, vector<3x256xf32>
    %75 = arith.addf %67, %74 : vector<3x256xf32>
    %c0_42 = arith.constant 0 : index
    %c33 = arith.constant 33 : index
    %76 = vector.load %arg4[%c0_42, %c33] : memref<16x290xbf16, #tpu.memory_space<vmem>>, vector<16x256xbf16>
    %c0_43 = arith.constant 0 : index
    %c112 = arith.constant 112 : index
    %77 = vector.load %arg2[%c0_43, %c112] : memref<3x144xbf16, #tpu.memory_space<vmem>>, vector<3x16xbf16>
    %cst_44 = arith.constant dense<0.000000e+00> : vector<3x256xf32>
    %78 = tpu.matmul %77, %76, %cst_44 {dimension_numbers = #tpu.dot_dimension_numbers<[1], [0], [0], [1], [0, 0, 1, 1], [], []>} : vector<3x16xbf16>, vector<16x256xbf16>, vector<3x256xf32> -> vector<3x256xf32>
    %79 = arith.addf %75, %78 : vector<3x256xf32>
    %c0_45 = arith.constant 0 : index
    %c34 = arith.constant 34 : index
    %80 = vector.load %arg4[%c0_45, %c34] : memref<16x290xbf16, #tpu.memory_space<vmem>>, vector<16x256xbf16>
    %c0_46 = arith.constant 0 : index
    %c128 = arith.constant 128 : index
    %81 = vector.load %arg2[%c0_46, %c128] : memref<3x144xbf16, #tpu.memory_space<vmem>>, vector<3x16xbf16>
    %cst_47 = arith.constant dense<0.000000e+00> : vector<3x256xf32>
    %82 = tpu.matmul %81, %80, %cst_47 {dimension_numbers = #tpu.dot_dimension_numbers<[1], [0], [0], [1], [0, 0, 1, 1], [], []>} : vector<3x16xbf16>, vector<16x256xbf16>, vector<3x256xf32> -> vector<3x256xf32>
    %cst_48 = arith.constant 0.000000e+00 : f32
    %83 = vector.shape_cast %26 : vector<1x256xi1> to vector<1x256xi1>
    %84 = vector.broadcast %83 : vector<1x256xi1> to vector<3x256xi1>
    %85 = vector.broadcast %cst_48 : f32 to vector<3x256xf32>
    %86 = arith.select %84, %82, %85 : vector<3x256xi1>, vector<3x256xf32>
    %87 = arith.addf %79, %86 : vector<3x256xf32>
    %88 = math.tanh %87 : vector<3x256xf32>
    %c0_49 = arith.constant 0 : index
    %c0_50 = arith.constant 0 : index
    %c0_51 = arith.constant 0 : index
    %89 = vector.load %arg3[%c0_49, %c0_50, %c0_51] : memref<1x3x256xf32, #tpu.memory_space<vmem>>, vector<1x3x256xf32>
    %90 = vector.shape_cast %89 : vector<1x3x256xf32> to vector<3x256xf32>
    %91 = vector.shape_cast %88 : vector<3x256xf32> to vector<1x3x256xf32>
    tpu.vector_store %arg3[%c0_49, %c0_50, %c0_51], %91 {strides = array<i32>} : memref<1x3x256xf32, #tpu.memory_space<vmem>>, vector<1x3x256xf32>,
    return
  }
  func.func @transform_0(%arg0: i32) -> (i32, i32, i32) {
    %c0_i32 = arith.constant 0 : i32
    %c0_i32_0 = arith.constant 0 : i32
    %c0_i32_1 = arith.constant 0 : i32
    return %arg0, %c0_i32, %c0_i32_0 : i32, i32, i32
  }
  func.func @transform_1(%arg0: i32) -> (i32, i32) {
    %c0_i32 = arith.constant 0 : i32
    %c0_i32_0 = arith.constant 0 : i32
    %c0_i32_1 = arith.constant 0 : i32
    return %c0_i32, %c0_i32_0 : i32, i32
  }
  func.func @transform_2(%arg0: i32) -> (i32, i32, i32) {
    %c0_i32 = arith.constant 0 : i32
    %c0_i32_0 = arith.constant 0 : i32
    %c0_i32_1 = arith.constant 0 : i32
    return %arg0, %c0_i32, %c0_i32_0 : i32, i32, i32
  }
}

</mosaic_0001>

<bundles_post_ra>
// kernel: tpu_custom_call.1
= control target key start
LH: loop header
LB: loop body
LE: loop exit
PB: predicated region body
PF: predicated region fallthrough
CT: control target
= control target key end

     0   :  { %7 = vsyncpa [#allocation4], 0  ;;  %s1433_s0 = inlined_call_operand.hbm [shape: bf16[2,16,256], index: 0, kind: input, shape index: {}]   ;;  %s1434_s1 = inlined_call_operand.hbm [shape: bf16[3,144], index: 1, kind: input, shape index: {}]   ;;  %s1435_s2 = inlined_call_operand.vmem [shape: f32[2,3,256], index: 2, kind: output, shape index: {}]  }
   0x1   :  { %9 = vsyncpa [#allocation4 + $0x1], 0 }
   0x2   :  { %10 = vsyncpa [#allocation6], 0  ;;  %s1212_s9 = smov 0   ;;  %s1214_s10 = smov 0  }
   0x3   :  { %s1216_s11 = smov 0   ;;  %s1218_s12 = smov 0  }
   0x4 LB: > { %s1231_s13 = sadd.s32 4294967295, %s1175_s12   ;;  %s1234_s14 = sadd.s32 1, %s1175_s12   ;;  %s1175_s12 = sphi %s1218_s12, %s1461_s12   ;;  %s1171_s11 = sphi %s1216_s11, %s1460_s11   ;;  %s1167_s10 = sphi %s1214_s10, %s1459_s10   ;;  %s1163_s9 = sphi %s1212_s9, %s1458_s9  }
   0x5   : > { %s20_s15 = ssub.s32 %s1175_s12, %s1234_s14  ;;  %s23_s16 = sadd.s32 1, %s1171_s11 }
   0x6   : > { %p21_p0 = scmp.eq.s32.totalorder %s20_s15, 0  ;;  %p30_p1 = scmp.ne.s32.totalorder %s1171_s11, %s1167_s10 }
   0x7   : > { %p31_p2 = scmp.eq.s32.totalorder %s1175_s12, 0  ;;  %p36_p3 = scmp.ne.s32.totalorder %s1167_s10, %s1163_s9 }
   0x8   : > { %s1244_s17 = scalar_select %p21_p0, %s1171_s11, %s23_s16  }
   0x9   : > { %p1246_p4 = por %p31_p2, %p30_p1  ;;  %p1436_p5 = scmp.eq.s32.totalorder %s1231_s13, 0 }
   0xa   : > { %p972_p6 = scmp.ge.s32.totalorder %s1175_s12, 1  ;;  %p94_p7 = scmp.lt.s32.totalorder %s1175_s12, 3 }
   0xb   : > { %p1255_p8 = por %p1436_p5, %p36_p3  ;;  %s1177_s21 = smov [#allocation5]  }
   0xc   : > { %p1259_p9 = pnand %p972_p6, %p94_p7  ;;  %s107_s22 = sshll.u32 %s1177_s21, 4  ;;  %s108_s22 = int_to_ptr.vmem [resolvable:$true] %s107_s22 }
   0xd   : > { %s1441_s19 = scalar_select %p1255_p8, 1, 0 }
   0xe   : > { %s1442_s20 = scalar_select %p1259_p9, 1, 0 }
   0xf   : > { %p1010_p10 = pneg %p1259_p9  ;;  %p1019_p11 = scmp.lt.s32.totalorder %s1175_s12, 2 }
  0x10   : > { %s118_s23 = sand.u32 1, %s1171_s11   ;;  %s1079_s29 = scalar_lea.hbm %s1434_s1, 64 }
  0x11   : > { %p1269_p12 = pnand %p1010_p10, %p1436_p5  ;;  %p1275_p13 = pnand %p1019_p11, %p1246_p4 }
  0x12   : > { %s975_s26 = sshll.u32 %s118_s23, 4  ;;  %p1080_p0 = scmp.ne.s32.totalorder %s1434_s1, %s1079_s29 }
  0x13   : > { %s1444_s25 = scalar_select %p1275_p13, 1, 0 }
  0x14   : > { %p1081_p1 = pneg %p1269_p12  ;;  %p1086_p4 = scmp.lt.u32.totalorder %s1079_s29, %s1434_s1 }
  0x16   : > { %p1082_p2 = pnand %p1081_p1, %p1080_p0 }
  0x18   : > { %p1083_p3 = pneg %p1082_p2 }
  0x1a   : > { %p1088_p6 = pnand %p1086_p4, %p1083_p3 }
  0x1c   : > { %1091 = shalt.err (!%p1088_p6)
}
  0x1d   : > { %s1092_s6 = scalar_lea.vmem %s108_s22, 64  ;;  %p1100_p5 = scmp.lt.s32.totalorder %s108_s22, %s108_s22 }
  0x1e   : > { %p1093_p7 = scmp.ne.s32.totalorder %s108_s22, %s1092_s6  ;;  %p1101_p8 = scmp.lt.s32.totalorder %s1092_s6, %s1092_s6 }
  0x20   : > { %p1095_p10 = pnand %p1093_p7, %p1081_p1  ;;  %p1102_p9 = por %p1101_p8, %p1100_p5 }
  0x22   : > { %p1096_p11 = pneg %p1095_p10 }
  0x24   : > { %p1103_p13 = pnand %p1102_p9, %p1096_p11 }
  0x26   : > { %1106 = shalt.err (!%p1103_p13)
}
  0x27   : > { %1013 = dma.hbm_to_vmem [thread:$0]  (!%p1269_p12), %s1434_s1, 64, %s108_s22, [#allocation6]  }
  0x28   : > { %s1002_s9 = sshll.u32 %s1175_s12, 8  ;;  %s122_s21 = scalar_lea.vmem [#allocation3], %s975_s26 }
  0x29   : > { %s1299_s18 = scalar_lea.hbm %s1433_s0, %s1002_s9  ;;  %s129_s27 = sshll.u32 %s122_s21, 4  ;;  %s1301_s27 = int_to_ptr.vmem [resolvable:$true] %s129_s27 }
  0x2a   : > { %s1303_s24 = scalar_lea.sflag [#allocation4], %s118_s23  ;;  %s1107_s28 = scalar_lea.hbm %s1299_s18, 256 }
  0x2b   : > { %p1108_p5 = scmp.ne.s32.totalorder %s1299_s18, %s1107_s28  ;;  %p1445_p8 = scmp.ne.s32.totalorder %s1444_s25, 0 }
  0x2c   : > { %s1112_s29 = scalar_lea.hbm %s1433_s0, 512  ;;  %p1113_p0 = scmp.lt.u32.totalorder %s1299_s18, %s1433_s0 }
  0x2d   : > { %p1109_p9 = pneg %p1445_p8  ;;  %p1114_p1 = scmp.lt.u32.totalorder %s1112_s29, %s1107_s28 }
  0x2e   : > { %p1116_p3 = scmp.lt.u32.totalorder %s1107_s28, %s1299_s18 }
  0x2f   : > { %p1110_p12 = pnand %p1109_p9, %p1108_p5  ;;  %p1115_p2 = por %p1114_p1, %p1113_p0 }
  0x31   : > { %p1111_p13 = pneg %p1110_p12  ;;  %p1117_p4 = por %p1116_p3, %p1115_p2 }
  0x33   : > { %p1118_p6 = pnand %p1117_p4, %p1111_p13 }
  0x35   : > { %1121 = shalt.err (!%p1118_p6)
}
  0x36   : > { %s1122_s23 = scalar_lea.vmem %s1301_s27, 256  ;;  %s1178_s26 = smov [#allocation3]  }
  0x37   : > { %p1123_p7 = scmp.ne.s32.totalorder %s1301_s27, %s1122_s23  ;;  %s1127_s4 = sshll.u32 %s1178_s26, 4  ;;  %s1128_s4 = int_to_ptr.vmem [resolvable:$false] %s1127_s4 }
  0x38   : > { %s1129_s5 = scalar_lea.vmem %s1128_s4, 512  ;;  %p1130_p5 = scmp.lt.s32.totalorder %s1301_s27, %s1128_s4 }
  0x39   : > { %p1125_p10 = pnand %p1123_p7, %p1109_p9  ;;  %p1131_p12 = scmp.lt.s32.totalorder %s1129_s5, %s1122_s23 }
  0x3b   : > { %p1126_p11 = pneg %p1125_p10  ;;  %p1132_p0 = por %p1131_p12, %p1130_p5 }
  0x3d   : > { %p1133_p1 = pnand %p1132_p0, %p1126_p11 }
  0x3f   : > { %1136 = shalt.err (!%p1133_p1)
}
  0x40   : > { %s1179_s6 = smov 128   ;;  %s1180_s7 = smov 8  }
  0x41   : > { %1017 = dma.hbm_to_vmem [thread:$0]  (!%p1445_p8), %s1299_s18, 256, %s1301_s27, %s1303_s24, %s1179_s6, %s1179_s6, %s1180_s7  }
  0x42   : > { %p1446_p9 = scmp.ne.s32.totalorder %s1442_s20, 0 }
  0x43   : > { %s143_s8 = sand.u32 (!%p1446_p9), 1, %s1167_s10   ;;  %p1447_p13 = scmp.ne.s32.totalorder (!%p1446_p9), %s1441_s19, 0 }
  0x44   : > { %141 = sbr.rel (%p1446_p9) target bundleno = 609 (0x261), region = 28  ;;  %s979_s9 = sshll.u32 (!%p1446_p9), %s143_s8, 4 }
  0x45   : > { %s144_s15 = scalar_lea.sflag (!%p1446_p9), [#allocation4], %s143_s8  ;;  %s147_s16 = scalar_lea.vmem (!%p1446_p9), [#allocation3], %s979_s9 }
  0x4b   : > { %1154 = dma.done.wait (%p1447_p13), %s144_s15, 256  }
  0x4c   : > { %1156 = vsyncadd (%p1447_p13), %s144_s15, 4294967040  ;;  %p1448_p2 = scmp.eq.s32.totalorder %s1231_s13, 0 }
  0x4e   : > { %1158 = dma.done.wait (%p1448_p2), [#allocation6], 64   ;;  %p1449_p3 = pmov %p1448_p2 }
  0x4f   : > { %vm178_vm0 = vcmask 138240   ;;  %v1181_v0 = vmov 0   ;;  %v205_v1 = vlaneseq  ;;  %vm180_vm1 = vcmask 277640   ;;  %v1072_v6 = vld [vmem:[%s147_s16] ss:$8 sps:$4 sm:$0xff]   ;;  %s1183_s19 = smov 17  }
  0x50   : > { %1160 = vsyncadd (%p1449_p3), [#allocation6], 4294967232  ;;  %179 = vst.msk [vmem:[#allocation2] sm:$0xff] %vm178_vm0, %v1181_v0  ;;  %275 = vmatprep.mubr.bf16.mxu0 %v1181_v0  ;;  %354 = vmatprep.mubr.bf16.mxu1 %v1181_v0  ;;  %v1182_v2 = vmov 1983009808   ;;  %s1184_s20 = smov 96  }
  0x51   : > { %v297_v3 = vunpack.c.l.s4 %v1182_v2  ;;  %181 = vst.msk [vmem:[#allocation2 + $0x10] sm:$0xff] %vm180_vm1, %v1181_v0  ;;  %v300_v5 = vshrl.u32 %v205_v1, 7  ;;  %v1074_v7 = vld [vmem:[%s147_s16 + $0x4] ss:$8 sps:$4 sm:$0xff]   ;;  %192 = vrot.lane.b32.xlu0 %v1072_v6, %s1183_s19  ;;  %v238_v10 = vld [vmem:[#allocation5] sm:$0x3] }
  0x52   : > { %v987_v9 = vld.sshfl [vmem:[#allocation5] sm:$0x3 pattern:$0x76325410]  ;;  %s1185_s25 = smov 64   ;;  %s1186_s18 = smov 112  }
  0x53   : > { %v298_v4 = vunpack.c.0.s8 %v297_v3  ;;  %377 = vrot.lane.b32.xlu1 %v987_v9, %s1184_s20  ;;  %s1187_s21 = smov 80   ;;  %vm201_vm2 = vcmask 1047688   ;;  %s1188_s27 = smov 127   ;;  %vm239_vm3 = vcmask 130048   ;;  %vm314_vm4 = vcmask 1039360  }
  0x54   : > { %s1189_s24 = smov 126   ;;  %s1190_s28 = smov 111   ;;  %vm468_vm5 = vcmask 916480   ;;  %vm388_vm6 = vcmask 1031168   ;;  %vm618_vm7 = vcmask 900096   ;;  %vm544_vm8 = vcmask 908288  }
  0x55   : > { %v301_v8 = vsub.s32 %v298_v4, %v300_v5  ;;  %194 = vrot.lane.b32.xlu0 %v1074_v7, %s1183_s19  ;;  %s1191_s12 = smov 110   ;;  %s1192_s22 = smov 48   ;;  %vm694_vm9 = vcmask 785408   ;;  %vm770_vm10 = vcmask 777216   ;;  %vm834_vm11 = vcmask 769024  }
  0x56   : > { %s1193_s29 = smov 95   ;;  %s1194_s30 = smov 32   ;;  %v824_v2 = vld [vmem:[#allocation5 + $0x2] sm:$0x3]  ;;  %v206_v7 = vand.u32 127, %v205_v1 }
  0x57   : > { %v302_v11 = vrot.slane %v238_v10, %v301_v8  ;;  %533 = vrot.lane.b32.xlu1 %v987_v9, %s1185_s25  ;;  %s1195_s3 = smov 94   ;;  %s1196_s23 = smov 16  }
  0x58   : > { %v207_v8 = vadd.s32 128, %v206_v7  ;;  %p172_p8 = scmp.lt.s32.totalorder %s1231_s13, 1 }
  0x59   : > { %303 = vrot.lane.b32.xlu0 %v302_v11, %s1186_s18 }
  0x5a   : > { %s1463_s13 = smov (!%p172_p8, %s1231_s13), 1 }
  0x5b   : > { %s1003_s26 = sshll.u32 %s1463_s13, 3 }
  0x5c   : > { %s176_s6 = scalar_lea.vmem %s1435_s2, %s1003_s26 }
  0x5d   : > { %457 = vrot.lane.b32.xlu0 %v987_v9, %s1187_s21 }
  0xc3   : > { %v193_v12 = vpop.permute.xlu0 %192 }
  0xc4   : > { %202 = vst.msk [vmem:[#allocation2] sm:$0xff] %vm201_vm2, %v193_v12 }
  0xc5   : > { %v378_v18 = vpop.permute.xlu1 %377 }
  0xc7   : > { %v195_v13 = vpop.permute.xlu0 %194 }
  0xc8   : > { %v197_v14 = vsel %vm178_vm0, %v193_v12, %v195_v13  ;;  %204 = vst.msk [vmem:[#allocation2 + $0x10] sm:$0xff] %vm178_vm0, %v195_v13 }
  0xc9   : > { %243 = vmatprep.subr.bf16.mxu0 %v197_v14  ;;  %v534_v20 = vpop.permute.xlu1 %533 }
  0xcb   : > { %v292_v15 = vld [vmem:[#allocation2] sm:$0xff]  ;;  %v304_v17 = vpop.permute.xlu0 %303 }
  0xcc   : > { %308 = vrot.lane.b32.xlu0 %v292_v15, %s1188_s27  ;;  %244 = vmatpush1.bf16.msra.mxu0 %v292_v15 }
  0xcf   : > { %v294_v16 = vld [vmem:[#allocation2 + $0x10] sm:$0xff]  ;;  %985 = vmatmul.mubr.msk.bf16.vlgmr.msra.gmra.mrb[0].mxu0 %vm239_vm3, %v238_v10  ;;  %v458_v19 = vpop.permute.xlu0 %457 }
  0xd0   : > { %312 = vrot.lane.b32.xlu1 %v294_v16, %s1188_s27  ;;  %386 = vrot.lane.b32.xlu0 %v294_v16, %s1189_s24 }
  0xd1   : > { %428 = vmatprep.mubr.bf16.mxu0 %v1181_v0 }
  0xd4   : > { %382 = vrot.lane.b32.xlu1 %v292_v15, %s1189_s24  ;;  %462 = vrot.lane.b32.xlu0 %v292_v15, %s1186_s18 }
  0xd8   : > { %466 = vrot.lane.b32.xlu1 %v294_v16, %s1186_s18  ;;  %542 = vrot.lane.b32.xlu0 %v294_v16, %s1190_s28 }
  0xdc   : > { %538 = vrot.lane.b32.xlu1 %v292_v15, %s1190_s28  ;;  %612 = vrot.lane.b32.xlu0 %v292_v15, %s1191_s12 }
  0xe0   : > { %616 = vrot.lane.b32.xlu1 %v294_v16, %s1191_s12  ;;  %692 = vrot.lane.b32.xlu0 %v294_v16, %s1184_s20 }
  0xe4   : > { %310 = vrot.lane.b32.xlu1 %v197_v14, %s1188_s27  ;;  %464 = vrot.lane.b32.xlu0 %v197_v14, %s1186_s18 }
  0xe8   : > { %384 = vrot.lane.b32.xlu1 %v197_v14, %s1189_s24  ;;  %607 = vrot.lane.b32.xlu0 %v987_v9, %s1192_s22 }
  0xec   : > { %688 = vrot.lane.b32.xlu1 %v292_v15, %s1184_s20  ;;  %614 = vrot.lane.b32.xlu0 %v197_v14, %s1191_s12 }
  0xf0   : > { %540 = vrot.lane.b32.xlu1 %v197_v14, %s1190_s28  ;;  %764 = vrot.lane.b32.xlu0 %v292_v15, %s1193_s29 }
  0xf4   : > { %683 = vrot.lane.b32.xlu1 %v987_v9, %s1194_s30  ;;  %766 = vrot.lane.b32.xlu0 %v197_v14, %s1193_s29 }
  0xf8   : > { %690 = vrot.lane.b32.xlu1 %v197_v14, %s1184_s20  ;;  %832 = vrot.lane.b32.xlu0 %v294_v16, %s1195_s3 }
  0xfc   : > { %768 = vrot.lane.b32.xlu1 %v294_v16, %s1193_s29  ;;  %759 = vrot.lane.b32.xlu0 %v987_v9, %s1196_s23  ;;  %v212_v9 = vand.u32 15, %v206_v7 }
  0xfe   : > { %vm1375_vm12 = vcmp.ne.s32.totalorder %v212_v9, 0  ;;  %vm1387_vm14 = vcmp.ne.s32.totalorder %v212_v9, 15 }
 0x100   : > { %830 = vrot.lane.b32.xlu1 %v197_v14, %s1195_s3 }
 0x104   : > { %828 = vrot.lane.b32.xlu1 %v292_v15, %s1195_s3 }
 0x13e   : > { %v309_v21 = vpop.permute.xlu0 %308 }
 0x142   : > { %v313_v22 = vpop.permute.xlu1 %312  ;;  %v387_v23 = vpop.permute.xlu0 %386 }
 0x146   : > { %v383_v24 = vpop.permute.xlu1 %382  ;;  %v463_v25 = vpop.permute.xlu0 %462 }
 0x14a   : > { %v467_v26 = vpop.permute.xlu1 %466  ;;  %v543_v27 = vpop.permute.xlu0 %542 }
 0x14e   : > { %v539_v28 = vpop.permute.xlu1 %538  ;;  %v613_v29 = vpop.permute.xlu0 %612 }
 0x152   : > { %v617_v30 = vpop.permute.xlu1 %616  ;;  %v693_v31 = vpop.permute.xlu0 %692 }
 0x156   : > { %v311_v32 = vpop.permute.xlu1 %310  ;;  %v465_v33 = vpop.permute.xlu0 %464 }
 0x157   : > { %v316_v34 = vsel %vm314_vm4, %v311_v32, %v313_v22  ;;  %v315_v35 = vsel %vm314_vm4, %v309_v21, %v311_v32  ;;  %v470_v36 = vsel %vm468_vm5, %v465_v33, %v467_v26  ;;  %v469_v41 = vsel %vm468_vm5, %v463_v25, %v465_v33 }
 0x158   : > { %322 = vmatprep.subr.bf16.mxu1 %v316_v34 }
 0x159   : > { %323 = vmatpush1.bf16.msra.mxu1 %v315_v35 }
 0x15a   : > { %v385_v37 = vpop.permute.xlu1 %384  ;;  %476 = vmatprep.subr.bf16.mxu1 %v470_v36  ;;  %v608_v38 = vpop.permute.xlu0 %607 }
 0x15b   : > { %v389_v39 = vsel %vm388_vm6, %v383_v24, %v385_v37  ;;  %v390_v40 = vsel %vm388_vm6, %v385_v37, %v387_v23 }
 0x15c   : > { %986 = vmatmul.mubr.msk.bf16.vlgmr.msra.gmra.mrb[0].mxu1 %vm239_vm3, %v304_v17  ;;  %396 = vmatprep.subr.bf16.mxu0 %v390_v40 }
 0x15d   : > { %397 = vmatpush1.bf16.msra.mxu0 %v389_v39  ;;  %477 = vmatpush1.bf16.msra.mxu1 %v469_v41 }
 0x15e   : > { %v689_v42 = vpop.permute.xlu1 %688  ;;  %v615_v43 = vpop.permute.xlu0 %614  ;;  %508 = vmatprep.mubr.bf16.mxu1 %v1181_v0 }
 0x15f   : > { %v620_v44 = vsel %vm618_vm7, %v615_v43, %v617_v30  ;;  %v619_v49 = vsel %vm618_vm7, %v613_v29, %v615_v43 }
 0x160   : > { %988 = vmatmul.mubr.msk.bf16.vlgmr.msra.gmra.mrb[4].mxu0 %vm239_vm3, %v378_v18  ;;  %626 = vmatprep.subr.bf16.mxu1 %v620_v44 }
 0x161   : > { %584 = vmatprep.mubr.bf16.mxu0 %v1181_v0 }
 0x162   : > { %v541_v45 = vpop.permute.xlu1 %540  ;;  %v765_v46 = vpop.permute.xlu0 %764 }
 0x163   : > { %v545_v47 = vsel %vm544_vm8, %v539_v28, %v541_v45  ;;  %v546_v48 = vsel %vm544_vm8, %v541_v45, %v543_v27 }
 0x164   : > { %990 = vmatmul.mubr.msk.bf16.vlgmr.msra.gmra.mrb[4].mxu1 %vm239_vm3, %v458_v19  ;;  %552 = vmatprep.subr.bf16.mxu0 %v546_v48 }
 0x165   : > { %627 = vmatpush1.bf16.msra.mxu1 %v619_v49  ;;  %553 = vmatpush1.bf16.msra.mxu0 %v545_v47 }
 0x166   : > { %v684_v50 = vpop.permute.xlu1 %683  ;;  %658 = vmatprep.mubr.bf16.mxu1 %v1181_v0  ;;  %v767_v51 = vpop.permute.xlu0 %766 }
 0x167   : > { %v771_v58 = vsel %vm770_vm10, %v765_v46, %v767_v51 }
 0x168   : > { %992 = vmatmul.mubr.msk.bf16.vlgmr.msra.gmra.mrb[8].mxu0 %vm239_vm3, %v534_v20 }
 0x169   : > { %734 = vmatprep.mubr.bf16.mxu0 %v1181_v0 }
 0x16a   : > { %v691_v52 = vpop.permute.xlu1 %690  ;;  %v833_v55 = vpop.permute.xlu0 %832 }
 0x16b   : > { %v695_v53 = vsel %vm694_vm9, %v689_v42, %v691_v52  ;;  %v696_v54 = vsel %vm694_vm9, %v691_v52, %v693_v31 }
 0x16c   : > { %994 = vmatmul.mubr.msk.bf16.vlgmr.msra.gmra.mrb[8].mxu1 %vm239_vm3, %v608_v38  ;;  %702 = vmatprep.subr.bf16.mxu0 %v696_v54 }
 0x16d   : > { %703 = vmatpush1.bf16.msra.mxu0 %v695_v53  ;;  %810 = vmatprep.mubr.bf16.mxu1 %v1181_v0 }
 0x16e   : > { %v769_v56 = vpop.permute.xlu1 %768  ;;  %v760_v59 = vpop.permute.xlu0 %759 }
 0x16f   : > { %v772_v57 = vsel %vm770_vm10, %v767_v51, %v769_v56 }
 0x170   : > { %996 = vmatmul.mubr.msk.bf16.vlgmr.msra.gmra.mrb[12].mxu0 %vm239_vm3, %v684_v50  ;;  %778 = vmatprep.subr.bf16.mxu1 %v772_v57 }
 0x171   : > { %779 = vmatpush1.bf16.msra.mxu1 %v771_v58  ;;  %874 = vmatprep.mubr.bf16.mxu0 %v1181_v0  ;;  %v219_v0 = vand.u32 15, %v207_v8 }
 0x172   : > { %v831_v60 = vpop.permute.xlu1 %830 }
 0x173   : > { %v836_v61 = vsel %vm834_vm11, %v831_v60, %v833_v55  ;;  %vm1379_vm13 = vcmp.ne.s32.totalorder %v219_v0, 0  ;;  %vm1391_vm15 = vcmp.ne.s32.totalorder %v219_v0, 15 }
 0x174   : > { %998 = vmatmul.mubr.msk.bf16.vlgmr.msra.gmra.mrb[12].mxu1 %vm239_vm3, %v760_v59  ;;  %842 = vmatprep.subr.bf16.mxu0 %v836_v61 }
 0x176   : > { %v829_v62 = vpop.permute.xlu1 %828 }
 0x177   : > { %v835_v63 = vsel %vm834_vm11, %v829_v62, %v831_v60 }
 0x178   : > { %843 = vmatpush1.bf16.msra.mxu0 %v835_v63 }
 0x17b   : > { %999 = vmatmul.mubr.msk.bf16.vlgmr.msra.gmra.mrb[16].mxu0 %vm239_vm3, %v824_v2 }
 0x1a2   : > { %v277_v3 = vpop.f32.mrb[0].mxu0 }
 0x1a3   : > { %v279_v4 = vpop.f32.mrb[1].mxu0  ;;  %v288_v12 = vsel %vm1375_vm12, %v277_v3, 0.0 }
 0x1a4   : > { %v281_v5 = vpop.f32.mrb[2].mxu0  ;;  %v289_v13 = vsel %vm1379_vm13, %v279_v4, 0.0 }
 0x1a5   : > { %v282_v6 = vpop.f32.mrb[3].mxu0 }
 0x22f   : > { %v356_v14 = vpop.f32.mrb[0].mxu1 }
 0x230   : > { %v363_v15 = vadd.f32 %v356_v14, %v288_v12  ;;  %v358_v1 = vpop.f32.mrb[1].mxu1 }
 0x231   : > { %v364_v16 = vadd.f32 %v358_v1, %v289_v13  ;;  %v360_v17 = vpop.f32.mrb[2].mxu1 }
 0x232   : > { %v361_v19 = vpop.f32.mrb[3].mxu1 }
 0x233   : > { %v430_v21 = vpop.f32.mrb[4].mxu0 }
 0x234   : > { %v441_v22 = vsel %vm1387_vm14, %v430_v21, 0.0  ;;  %v432_v23 = vpop.f32.mrb[5].mxu0 }
 0x235   : > { %v443_v24 = vadd.f32 %v441_v22, %v363_v15  ;;  %v442_v25 = vsel %vm1391_vm15, %v432_v23, 0.0  ;;  %v434_v26 = vpop.f32.mrb[6].mxu0 }
 0x236   : > { %v444_v27 = vadd.f32 %v442_v25, %v364_v16  ;;  %v435_v28 = vpop.f32.mrb[7].mxu0 }
 0x237   : > { %v510_v29 = vpop.f32.mrb[4].mxu1 }
 0x238   : > { %v517_v30 = vsel %vm1375_vm12, %v510_v29, 0.0  ;;  %v512_v31 = vpop.f32.mrb[5].mxu1 }
 0x239   : > { %v519_v32 = vadd.f32 %v517_v30, %v443_v24  ;;  %v518_v33 = vsel %vm1379_vm13, %v512_v31, 0.0  ;;  %v514_v34 = vpop.f32.mrb[6].mxu1 }
 0x23a   : > { %v520_v35 = vadd.f32 %v518_v33, %v444_v27  ;;  %v515_v36 = vpop.f32.mrb[7].mxu1 }
 0x23b   : > { %v586_v37 = vpop.f32.mrb[8].mxu0 }
 0x23c   : > { %v593_v38 = vadd.f32 %v586_v37, %v519_v32  ;;  %v588_v39 = vpop.f32.mrb[9].mxu0 }
 0x23d   : > { %v594_v40 = vadd.f32 %v588_v39, %v520_v35  ;;  %v590_v41 = vpop.f32.mrb[10].mxu0 }
 0x23e   : > { %v591_v42 = vpop.f32.mrb[11].mxu0 }
 0x23f   : > { %v660_v43 = vpop.f32.mrb[8].mxu1 }
 0x240   : > { %v667_v44 = vsel %vm1387_vm14, %v660_v43, 0.0  ;;  %v662_v45 = vpop.f32.mrb[9].mxu1 }
 0x241   : > { %v669_v46 = vadd.f32 %v667_v44, %v593_v38  ;;  %v668_v47 = vsel %vm1391_vm15, %v662_v45, 0.0  ;;  %v664_v48 = vpop.f32.mrb[10].mxu1 }
 0x242   : > { %v670_v49 = vadd.f32 %v668_v47, %v594_v40  ;;  %v665_v50 = vpop.f32.mrb[11].mxu1 }
 0x243   : > { %v736_v51 = vpop.f32.mrb[12].mxu0 }
 0x244   : > { %v743_v52 = vsel %vm1375_vm12, %v736_v51, 0.0  ;;  %v738_v53 = vpop.f32.mrb[13].mxu0 }
 0x245   : > { %v745_v54 = vadd.f32 %v743_v52, %v669_v46  ;;  %v744_v55 = vsel %vm1379_vm13, %v738_v53, 0.0  ;;  %v740_v56 = vpop.f32.mrb[14].mxu0 }
 0x246   : > { %v746_v57 = vadd.f32 %v744_v55, %v670_v49  ;;  %v741_v58 = vpop.f32.mrb[15].mxu0 }
 0x247   : > { %v812_v59 = vpop.f32.mrb[12].mxu1 }
 0x248   : > { %v819_v60 = vadd.f32 %v812_v59, %v745_v54  ;;  %v814_v61 = vpop.f32.mrb[13].mxu1 }
 0x249   : > { %v820_v62 = vadd.f32 %v814_v61, %v746_v57  ;;  %v816_v63 = vpop.f32.mrb[14].mxu1 }
 0x24a   : > { %v817_v2 = vpop.f32.mrb[15].mxu1 }
 0x24e   : > { %v876_v3 = vpop.f32.mrb[16].mxu0 }
 0x24f   : > { %v883_v4 = vsel %vm1387_vm14, %v876_v3, 0.0  ;;  %v878_v5 = vpop.f32.mrb[17].mxu0 }
 0x250   : > { %v885_v6 = vadd.f32 %v883_v4, %v819_v60  ;;  %v884_v7 = vsel %vm1391_vm15, %v878_v5, 0.0  ;;  %v880_v8 = vpop.f32.mrb[18].mxu0 }
 0x251   : > { %v886_v9 = vadd.f32 %v884_v7, %v820_v62  ;;  %v881_v0 = vpop.f32.mrb[19].mxu0 }
 0x252   : > { %1075 = vtanh.f32 %v885_v6 }
 0x253   : > { %1077 = vtanh.f32 %v886_v9 }
 0x25c   : > { %v1076_v10 = vpop.eup %1075 }
 0x25d   : > { %v1078_v11 = vpop.eup %1077 }
 0x25e   : > { %v891_v12 = vcombine.low %v1076_v10, %v1078_v11 }
 0x260   : > { %893 = vst [vmem:[%s176_s6] sm:$0x77] %v891_v12 }
 0x261 PF: > { %p13_p4 = scmp.ge.s32.totalorder %s1234_s14, 4   ;;  %s1458_s9 = smov %s1167_s10 }
 0x262   : > { %s1459_s10 = smov %s1171_s11  ;;  %s1460_s11 = smov %s1244_s17 }
 0x263   : > { %s1461_s12 = smov %s1234_s14  ;;  %15 = sbr.rel (!%p13_p4) target bundleno = 4 (0x4), region = 72 }
 0x26a   :  { %915 = vsyncpa [#allocation4], 1 }
 0x26b   :  { %917 = vsyncpa [#allocation4 + $0x1], 1 }
 0x26c   :  { %918 = vsyncpa [#allocation6], 1 }

</bundles_post_ra>
